<compile_context>
chip_gen: v5e
topology: v5e:2x2
jax: 0.10.0
libtpu: 0.0.40
codegen_flags: <defaults>
</compile_context>

<pallas_src>
import jax
import jax.numpy as jnp
from jax import lax
from jax.experimental import pallas as pl
from jax.experimental.pallas import tpu as pltpu


def _round_up(x, m):
    return (x + m - 1) // m * m


def _vmem_capacity_bytes():
    """Per-TensorCore VMEM capacity, with a conservative (v7x) fallback."""
    try:
        info = pltpu.get_tpu_info()
        for name in ("vmem_capacity_bytes", "vmem_bytes", "vmem_size_bytes"):
            val = getattr(info, name, None)
            if val:
                return int(val)
    except Exception:
        pass
    return 64 << 20


def _pick_block_m(m, block_m_max, fits):
    """Largest multiple-of-8 divisor of m that fits VMEM; prefer >=2 grid steps.

    Returns (tile_m, padded_m); padded_m != m only on the fallback path.
    """
    limit = min(block_m_max, m)
    cands = [d for d in range(8, limit + 1, 8) if m % d == 0 and fits(d)]
    if cands:
        multi = [d for d in cands if m // d >= 2]
        return (max(multi) if multi else max(cands)), m
    # Fallback (tiny or oddly sized m): pad m up to a multiple of the tile.
    tm = max(8, min(block_m_max, _round_up(m, 8)))
    while tm > 8 and not fits(tm):
        tm -= 8
    return tm, _round_up(m, tm)


def _patch_embed_kernel(x_ref, w_ref, b_ref, o_ref):
    # x_ref: [TM, Kp] (bf16), w_ref: [Kp, Ep] (bf16), b_ref: [1, Ep] (f32),
    # o_ref: [TM, Ep].  MXU matmul with f32 accumulation; bias added in f32.
    acc = jnp.dot(x_ref[...], w_ref[...], preferred_element_type=jnp.float32)
    o_ref[...] = (acc + b_ref[...]).astype(o_ref.dtype)


def patch_embed_3d(x, weight, bias, *, patch_size, tubelet_size,
                   compute_dtype=jnp.bfloat16, out_dtype=jnp.bfloat16,
                   block_m=2048):
    """x: [B, C, T, H, W]; weight: [E, C, t, p, p]; bias: [E] -> [B, N, E]."""
    B, C, T, H, W = x.shape
    E = weight.shape[0]
    t, p = tubelet_size, patch_size
    assert T % t == 0 and H % p == 0 and W % p == 0, "input not patch-divisible"
    Tp, Hp, Wp = T // t, H // p, W // p
    N = Tp * Hp * Wp
    K = C * t * p * p
    M = B * N

    # --- glue: non-overlapping patch extraction, feature order (c, dt, dh, dw)
    #     to match the PyTorch Conv3d weight layout [E, C, t, p, p]; the bf16
    #     cast fuses into this transpose copy. ---
    # TODO(synk): fuse this relayout into the kernel (x BlockSpec over the raw
    #   [B, C, Tp, t, Hp, p, W] view + in-VMEM rebuild of the [TM, K] lhs) to
    #   cut X-side HBM traffic from ~8 B/elem to ~4 B/elem; kept in XLA for now
    #   because the required minor-dim merge (p*p patch lanes -> K lanes) has no
    #   reliably-lowering Mosaic relayout at these small tile dims.
    xp = x.reshape(B, C, Tp, t, Hp, p, Wp, p)
    xp = xp.transpose(0, 2, 4, 6, 1, 3, 5, 7)          # [B,Tp,Hp,Wp, C,t,p,p]
    xp = xp.reshape(M, K).astype(compute_dtype)        # [M, K]

    w_mat = weight.reshape(E, K).T.astype(compute_dtype)   # [K, E]
    b_mat = bias.astype(jnp.float32).reshape(1, E)          # [1, E]

    # --- lane / MXU alignment ---
    lane = 256 if E >= 256 else 128          # v6e/v7x MXUs are 2 x 256^2
    Ep = _round_up(E, lane)
    Kp = _round_up(K, 128)
    if Ep != E:
        w_mat = jnp.pad(w_mat, ((0, 0), (0, Ep - E)))
        b_mat = jnp.pad(b_mat, ((0, 0), (0, Ep - E)))
    if Kp != K:   # production K=1536 is already aligned; only small configs
        xp = jnp.pad(xp, ((0, 0), (0, Kp - K)))
        w_mat = jnp.pad(w_mat, ((0, Kp - K), (0, 0)))

    in_b = jnp.dtype(compute_dtype).itemsize
    out_b = jnp.dtype(out_dtype).itemsize
    vmem_cap = _vmem_capacity_bytes()
    budget = int(vmem_cap * 0.7)             # headroom for Mosaic scratch

    def tile_bytes(tm):
        return (2 * tm * Kp * in_b           # double-buffered X tiles
                + Kp * Ep * in_b             # resident weight (single buffer)
                + Ep * 4                     # resident bias
                + 2 * tm * Ep * out_b        # double-buffered out tiles
                + tm * Ep * 4)               # f32 matmul intermediate

    TM, Mp = _pick_block_m(M, block_m, lambda tm: tile_bytes(tm) <= budget)
    if Mp != M:   # fallback only (tiny / oddly sized M)
        xp = jnp.pad(xp, ((0, Mp - M), (0, 0)))

    grid = (Mp // TM,)
    vmem_limit = int(min(vmem_cap * 0.85,
                         max(tile_bytes(TM) * 5 // 4, 32 << 20)))

    cost = pl.CostEstimate(
        flops=2 * Mp * Kp * Ep,
        transcendentals=0,
        bytes_accessed=(Mp * Kp * in_b + Kp * Ep * in_b + Ep * 4
                        + Mp * Ep * out_b))

    def build(single_buffer_resident):
        if single_buffer_resident:
            # Resident operands: constant block index -> one buffer is enough.
            w_spec = pl.BlockSpec((Kp, Ep), lambda i: (0, 0),
                                  pipeline_mode=pl.Buffered(1))
            b_spec = pl.BlockSpec((1, Ep), lambda i: (0, 0),
                                  pipeline_mode=pl.Buffered(1))
        else:
            w_spec = pl.BlockSpec((Kp, Ep), lambda i: (0, 0))
            b_spec = pl.BlockSpec((1, Ep), lambda i: (0, 0))
        return pl.pallas_call(
            _patch_embed_kernel,
            out_shape=jax.ShapeDtypeStruct((Mp, Ep), out_dtype),
            grid_spec=pltpu.PrefetchScalarGridSpec(
                num_scalar_prefetch=0,
                grid=grid,
                in_specs=[
                    pl.BlockSpec((TM, Kp), lambda i: (i, 0)),   # streamed X
                    w_spec,                                      # resident W
                    b_spec,                                      # resident b
                ],
                out_specs=pl.BlockSpec((TM, Ep), lambda i: (i, 0)),
            ),
            compiler_params=pltpu.CompilerParams(
                dimension_semantics=("parallel",),
                vmem_limit_bytes=vmem_limit),
            cost_estimate=cost)

    try:
        out = build(True)(xp, w_mat, b_mat)
    except Exception:
        # Conservative guard: if this JAX/Mosaic build rejects Buffered(1) on
        # resident operands, fall back to default (double-buffered) specs.
        out = build(False)(xp, w_mat, b_mat)

    if Mp != M or Ep != E:
        out = out[:M, :E]
    return out.reshape(B, N, E)


def _reference(x, weight, bias, *, patch_size, tubelet_size):
    """Plain-JAX f32 reference with the same semantics as the PyTorch module."""
    t, p = tubelet_size, patch_size
    y = lax.conv_general_dilated(
        x.astype(jnp.float32), weight.astype(jnp.float32),
        window_strides=(t, p, p), padding="VALID",
        dimension_numbers=("NCDHW", "OIDHW", "NCDHW"))
    y = y + bias.astype(jnp.float32)[None, :, None, None, None]
    B, E = y.shape[0], y.shape[1]
    y = y.reshape(B, E, -1)                # flatten(2)
    return jnp.transpose(y, (0, 2, 1))     # transpose(1, 2) -> [B, N, E]


if __name__ == "__main__":
    # Small shapes consistent with the module's forward.
    B, C, T, H, W = 2, 3, 4, 8, 8
    patch_size, tubelet_size, embed_dim = 4, 2, 32

    key = jax.random.PRNGKey(0)
    kx, kw, kb = jax.random.split(key, 3)
    x = jax.random.normal(kx, (B, C, T, H, W), dtype=jnp.float32)
    weight = jax.random.normal(
        kw, (embed_dim, C, tubelet_size, patch_size, patch_size),
        dtype=jnp.float32) * 0.02
    bias = jax.random.normal(kb, (embed_dim,), dtype=jnp.float32) * 0.02

    out = patch_embed_3d(
        x, weight, bias, patch_size=patch_size, tubelet_size=tubelet_size)
    out = jax.block_until_ready(out)

    ref = _reference(
        x, weight, bias, patch_size=patch_size, tubelet_size=tubelet_size)
    assert out.shape == ref.shape, (out.shape, ref.shape)
    # bf16 matmul inputs + bf16 output store vs f32 conv -> relaxed tolerance.
    assert jnp.allclose(out.astype(jnp.float32), ref, atol=3e-2, rtol=3e-2), \
        "mismatch vs conv reference"

    print("KERNEL_OK")
</pallas_src>

<mosaic_0001>
module attributes {stable_mosaic.version = 11 : i64} {
  func.func @_patch_embed_kernel(%arg0: i32, %arg1: memref<8x128xbf16, #tpu.memory_space<vmem>>, %arg2: memref<128x128xbf16, #tpu.memory_space<vmem>>, %arg3: memref<1x128xf32, #tpu.memory_space<vmem>>, %arg4: memref<8x128xbf16, #tpu.memory_space<vmem>>) attributes {dimension_semantics = [#tpu.dimension_semantics<parallel>], iteration_bounds = array<i64: 2>, scalar_prefetch = 0 : i64, scratch_operands = 0 : i64, tpu.core_type = #tpu.core_type<tc>, window_params = [{transform_indices = @transform_0, window_bounds = array<i64: 8, 128>}, {pipeline_mode = #tpu.pipeline_mode<synchronous>, transform_indices = @transform_1, window_bounds = array<i64: 128, 128>}, {pipeline_mode = #tpu.pipeline_mode<synchronous>, transform_indices = @transform_2, window_bounds = array<i64: 1, 128>}, {transform_indices = @transform_3, window_bounds = array<i64: 8, 128>}]} {
    %c0 = arith.constant 0 : index
    %c0_0 = arith.constant 0 : index
    %0 = vector.load %arg1[%c0, %c0_0] : memref<8x128xbf16, #tpu.memory_space<vmem>>, vector<8x128xbf16>
    %c0_1 = arith.constant 0 : index
    %c0_2 = arith.constant 0 : index
    %1 = vector.load %arg2[%c0_1, %c0_2] : memref<128x128xbf16, #tpu.memory_space<vmem>>, vector<128x128xbf16>
    %cst = arith.constant dense<0.000000e+00> : vector<8x128xf32>
    %2 = tpu.matmul %0, %1, %cst {dimension_numbers = #tpu.dot_dimension_numbers<[1], [0], [0], [1], [0, 0, 1, 1], [], []>} : vector<8x128xbf16>, vector<128x128xbf16>, vector<8x128xf32> -> vector<8x128xf32>
    %c0_3 = arith.constant 0 : index
    %c0_4 = arith.constant 0 : index
    %3 = vector.load %arg3[%c0_3, %c0_4] : memref<1x128xf32, #tpu.memory_space<vmem>>, vector<1x128xf32>
    %4 = vector.broadcast %3 : vector<1x128xf32> to vector<8x128xf32>
    %5 = arith.addf %2, %4 : vector<8x128xf32>
    %6 = arith.truncf %5 : vector<8x128xf32> to vector<8x128xbf16>
    %c0_5 = arith.constant 0 : index
    %c0_6 = arith.constant 0 : index
    %7 = vector.load %arg4[%c0_5, %c0_6] : memref<8x128xbf16, #tpu.memory_space<vmem>>, vector<8x128xbf16>
    tpu.vector_store %arg4[%c0_5, %c0_6], %6 {strides = array<i32>} : memref<8x128xbf16, #tpu.memory_space<vmem>>, vector<8x128xbf16>,
    return
  }
  func.func @transform_0(%arg0: i32) -> (i32, i32) {
    %c0_i32 = arith.constant 0 : i32
    %c0_i32_0 = arith.constant 0 : i32
    return %arg0, %c0_i32 : i32, i32
  }
  func.func @transform_1(%arg0: i32) -> (i32, i32) {
    %c0_i32 = arith.constant 0 : i32
    %c0_i32_0 = arith.constant 0 : i32
    %c0_i32_1 = arith.constant 0 : i32
    return %c0_i32, %c0_i32_0 : i32, i32
  }
  func.func @transform_2(%arg0: i32) -> (i32, i32) {
    %c0_i32 = arith.constant 0 : i32
    %c0_i32_0 = arith.constant 0 : i32
    %c0_i32_1 = arith.constant 0 : i32
    return %c0_i32, %c0_i32_0 : i32, i32
  }
  func.func @transform_3(%arg0: i32) -> (i32, i32) {
    %c0_i32 = arith.constant 0 : i32
    %c0_i32_0 = arith.constant 0 : i32
    return %arg0, %c0_i32 : i32, i32
  }
}

module attributes {stable_mosaic.version = 11 : i64} {
  func.func @_patch_embed_kernel(%arg0: i32, %arg1: memref<8x128xbf16, #tpu.memory_space<vmem>>, %arg2: memref<128x128xbf16, #tpu.memory_space<vmem>>, %arg3: memref<1x128xf32, #tpu.memory_space<vmem>>, %arg4: memref<8x128xbf16, #tpu.memory_space<vmem>>) attributes {dimension_semantics = [#tpu.dimension_semantics<parallel>], iteration_bounds = array<i64: 2>, scalar_prefetch = 0 : i64, scratch_operands = 0 : i64, tpu.core_type = #tpu.core_type<tc>, window_params = [{transform_indices = @transform_0, window_bounds = array<i64: 8, 128>}, {pipeline_mode = #tpu.pipeline_mode<synchronous>, transform_indices = @transform_1, window_bounds = array<i64: 128, 128>}, {pipeline_mode = #tpu.pipeline_mode<synchronous>, transform_indices = @transform_2, window_bounds = array<i64: 1, 128>}, {transform_indices = @transform_3, window_bounds = array<i64: 8, 128>}]} {
    %c0 = arith.constant 0 : index
    %c0_0 = arith.constant 0 : index
    %0 = vector.load %arg1[%c0, %c0_0] : memref<8x128xbf16, #tpu.memory_space<vmem>>, vector<8x128xbf16>
    %c0_1 = arith.constant 0 : index
    %c0_2 = arith.constant 0 : index
    %1 = vector.load %arg2[%c0_1, %c0_2] : memref<128x128xbf16, #tpu.memory_space<vmem>>, vector<128x128xbf16>
    %cst = arith.constant dense<0.000000e+00> : vector<8x128xf32>
    %2 = tpu.matmul %0, %1, %cst {dimension_numbers = #tpu.dot_dimension_numbers<[1], [0], [0], [1], [0, 0, 1, 1], [], []>} : vector<8x128xbf16>, vector<128x128xbf16>, vector<8x128xf32> -> vector<8x128xf32>
    %c0_3 = arith.constant 0 : index
    %c0_4 = arith.constant 0 : index
    %3 = vector.load %arg3[%c0_3, %c0_4] : memref<1x128xf32, #tpu.memory_space<vmem>>, vector<1x128xf32>
    %4 = vector.broadcast %3 : vector<1x128xf32> to vector<8x128xf32>
    %5 = arith.addf %2, %4 : vector<8x128xf32>
    %6 = arith.truncf %5 : vector<8x128xf32> to vector<8x128xbf16>
    %c0_5 = arith.constant 0 : index
    %c0_6 = arith.constant 0 : index
    %7 = vector.load %arg4[%c0_5, %c0_6] : memref<8x128xbf16, #tpu.memory_space<vmem>>, vector<8x128xbf16>
    tpu.vector_store %arg4[%c0_5, %c0_6], %6 {strides = array<i32>} : memref<8x128xbf16, #tpu.memory_space<vmem>>, vector<8x128xbf16>,
    return
  }
  func.func @transform_0(%arg0: i32) -> (i32, i32) {
    %c0_i32 = arith.constant 0 : i32
    %c0_i32_0 = arith.constant 0 : i32
    return %arg0, %c0_i32 : i32, i32
  }
  func.func @transform_1(%arg0: i32) -> (i32, i32) {
    %c0_i32 = arith.constant 0 : i32
    %c0_i32_0 = arith.constant 0 : i32
    %c0_i32_1 = arith.constant 0 : i32
    return %c0_i32, %c0_i32_0 : i32, i32
  }
  func.func @transform_2(%arg0: i32) -> (i32, i32) {
    %c0_i32 = arith.constant 0 : i32
    %c0_i32_0 = arith.constant 0 : i32
    %c0_i32_1 = arith.constant 0 : i32
    return %c0_i32, %c0_i32_0 : i32, i32
  }
  func.func @transform_3(%arg0: i32) -> (i32, i32) {
    %c0_i32 = arith.constant 0 : i32
    %c0_i32_0 = arith.constant 0 : i32
    return %arg0, %c0_i32 : i32, i32
  }
}

</mosaic_0001>

<bundles_post_ra>
// kernel: tpu_custom_call.1
= control target key start
LH: loop header
LB: loop body
LE: loop exit
PB: predicated region body
PF: predicated region fallthrough
CT: control target
= control target key end

     0   :  { %8 = vsyncpa [#allocation3], 0  ;;  %s793_s0 = inlined_call_operand.hbm [shape: bf16[16,128], index: 0, kind: input, shape index: {}]   ;;  %s794_s1 = inlined_call_operand.hbm [shape: bf16[128,128], index: 1, kind: input, shape index: {}]   ;;  %s795_s2 = inlined_call_operand.vmem [shape: f32[1,128], index: 2, kind: input, shape index: {}]   ;;  %s796_s3 = inlined_call_operand.hbm [shape: bf16[16,128], index: 3, kind: output, shape index: {}]  }
   0x1   :  { %10 = vsyncpa [#allocation3 + $0x1], 0 }
   0x2   :  { %11 = vsyncpa [#allocation6], 0 }
   0x3   :  { %12 = vsyncpa [#allocation4], 0 }
   0x4   :  { %14 = vsyncpa [#allocation4 + $0x1], 0  ;;  %s654_s12 = smov 0   ;;  %s656_s13 = smov 0  }
   0x5   :  { %s658_s14 = smov 0   ;;  %s660_s15 = smov 0  }
   0x6 LB: > { %s130_s18 = sshll.u32 %s794_s1, 4  ;;  %s678_s19 = sadd.s32 4294967295, %s629_s15   ;;  %s629_s15 = sphi %s660_s15, %s806_s15   ;;  %s625_s14 = sphi %s658_s14, %s805_s14   ;;  %s621_s13 = sphi %s656_s13, %s804_s13   ;;  %s617_s12 = sphi %s654_s12, %s803_s12   ;;  %s131_s18 = int_to_ptr.hbm [resolvable:$true] %s130_s18 }
   0x7   : > { %p386_p0 = scmp.ge.s32.totalorder %s629_s15, 1  ;;  %p41_p1 = scmp.eq.s32.totalorder %s678_s19, 0 }
   0x8   : > { %p119_p2 = scmp.lt.s32.totalorder %s629_s15, 3  ;;  %s631_s21 = smov [#allocation5]  }
   0x9   : > { %s132_s22 = sshll.u32 %s631_s21, 4  ;;  %s632_s23 = smov 64   ;;  %s133_s22 = int_to_ptr.vmem [resolvable:$true] %s132_s22 }
   0xa   : > { %p683_p3 = pnand %p386_p0, %p119_p2  ;;  %s633_s24 = smov 4  }
   0xb   : > { %s385_s25 = sadd.s32 4294967294, %s629_s15   ;;  %s694_s26 = sadd.s32 1, %s629_s15  }
   0xc   : > { %p447_p4 = pneg %p683_p3  ;;  %s27_s27 = sadd.s32 1, %s625_s14 }
   0xd   : > { %s24_s28 = ssub.s32 %s629_s15, %s694_s26  ;;  %p34_p7 = scmp.ne.s32.totalorder %s625_s14, %s621_s13 }
   0xe   : > { %p448_p6 = pnand %p447_p4, %p41_p1  ;;  %p25_p8 = scmp.eq.s32.totalorder %s24_s28, 0 }
   0xf   : > { %p35_p9 = scmp.eq.s32.totalorder %s629_s15, 0  ;;  %p40_p10 = scmp.ne.s32.totalorder %s621_s13, %s617_s12 }
  0x10   : > { %450 = dma.hbm_to_vmem [thread:$0]  (!%p448_p6), %s131_s18, 1024, %s133_s22, [#allocation6], %s632_s23, %s632_s23, %s633_s24  }
  0x11   : > { %p106_p11 = scmp.eq.s32.totalorder %s678_s19, 1  ;;  %p710_p12 = por %p41_p1, %p40_p10 }
  0x12   : > { %s706_s29 = scalar_select %p25_p8, %s625_s14, %s27_s27  }
  0x13   : > { %p714_p13 = por %p106_p11, %p34_p7  ;;  %p112_p0 = scmp.eq.s32.totalorder %s385_s25, 1 }
  0x14   : > { %p36_p2 = por %p35_p9, %p34_p7  ;;  %s149_s5 = sand.u32 1, %s625_s14  }
  0x15   : > { %p719_p4 = por %p112_p0, %p40_p10  ;;  %p460_p6 = scmp.lt.s32.totalorder %s629_s15, 2 }
  0x16   : > { %s389_s7 = sshll.u32 %s149_s5, 2  ;;  %s390_s8 = sshll.u32 %s629_s15, 2 }
  0x17   : > { %s157_s11 = scalar_lea.hbm %s793_s0, %s390_s8  ;;  %s153_s17 = scalar_lea.vmem [#allocation2], %s389_s7 }
  0x18   : > { %s159_s16 = sshll.u32 %s157_s11, 4  ;;  %s161_s18 = sshll.u32 %s153_s17, 4  ;;  %s160_s16 = int_to_ptr.hbm [resolvable:$true] %s159_s16  ;;  %s162_s18 = int_to_ptr.vmem [resolvable:$true] %s161_s18 }
  0x19   : > { %p728_p8 = pnand %p460_p6, %p36_p2  ;;  %s150_s22 = scalar_lea.sflag [#allocation3], %s149_s5 }
  0x1a   : > { %s529_s23 = sshra.s32 %s160_s16, 4  ;;  %s536_s28 = scalar_lea.hbm %s793_s0, 8  ;;  %s530_s23 = int_to_ptr.hbm [resolvable:$true] %s529_s23 }
  0x1b   : > { %s531_s24 = scalar_lea.hbm %s530_s23, 4  ;;  %p533_p9 = pneg %p728_p8 }
  0x1c   : > { %p532_p7 = scmp.ne.s32.totalorder %s530_s23, %s531_s24  ;;  %p537_p0 = scmp.lt.s32.totalorder %s530_s23, %s793_s0 }
  0x1d   : > { %p538_p2 = scmp.lt.s32.totalorder %s536_s28, %s531_s24 }
  0x1e   : > { %p534_p10 = pnand %p533_p9, %p532_p7 }
  0x1f   : > { %p539_p6 = por %p538_p2, %p537_p0 }
  0x20   : > { %p535_p11 = pneg %p534_p10 }
  0x22   : > { %p540_p5 = pnand %p539_p6, %p535_p11 }
  0x24   : > { %543 = shalt.err (!%p540_p5)
}
  0x25   : > { %454 = dma.hbm_to_vmem [thread:$0]  (!%p728_p8), %s160_s16, 64, %s162_s18, %s150_s22  }
  0x26   : > { %170 = sbr.rel (%p683_p3) target bundleno = 212 (0xd4), region = 32  ;;  %s745_s5 = sand.u32 (!%p683_p3), 1, %s621_s13  }
  0x27   : > { %s392_s9 = sshll.u32 (!%p683_p3), %s745_s5, 2  ;;  %s173_s10 = scalar_lea.sflag (!%p683_p3), [#allocation3], %s745_s5 }
  0x28   : > { %s176_s11 = scalar_lea.vmem (!%p683_p3), [#allocation2], %s392_s9 }
  0x2b   : > { %604 = dma.done.wait (%p710_p12), %s173_s10, 64  }
  0x2c   : > { %606 = vsyncadd (%p710_p12), %s173_s10, 4294967232 }
  0x2d   : > { %608 = dma.done.wait (%p41_p1), [#allocation6], 1024  }
  0x2e   : > { %610 = vsyncadd (%p41_p1), [#allocation6], 4294966272  ;;  %v438_v0 = vld [vmem:[#allocation5 + $0x38] sm:$0xff]  ;;  %v437_v1 = vld [vmem:[#allocation5 + $0x30] sm:$0xff]  ;;  %s428_s20 = sshll.u32 %s678_s19, 2  ;;  %s204_s22 = scalar_lea.vmem [#allocation7], %s392_s9 }
  0x2f   : > { %274 = vmatpush.bf16.msra.mxu0 %v438_v0  ;;  %v436_v2 = vld [vmem:[#allocation5 + $0x28] sm:$0xff]  ;;  %v435_v3 = vld [vmem:[#allocation5 + $0x20] sm:$0xff]  ;;  %v434_v4 = vld [vmem:[#allocation5 + $0x18] sm:$0xff]  ;;  %s300_s21 = scalar_lea.hbm %s796_s3, %s428_s20  ;;  %s302_s23 = sshll.u32 %s204_s22, 4  ;;  %s303_s23 = int_to_ptr.vmem [resolvable:$true] %s302_s23 }
  0x30   : > { %v433_v5 = vld [vmem:[#allocation5 + $0x10] sm:$0xff]  ;;  %v432_v6 = vld [vmem:[#allocation5 + $0x8] sm:$0xff]  ;;  %v431_v7 = vld [vmem:[#allocation5] sm:$0xff]  ;;  %s304_s24 = sshll.u32 %s300_s21, 4  ;;  %s290_s25 = scalar_lea.sflag [#allocation4], %s745_s5  ;;  %s305_s24 = int_to_ptr.hbm [resolvable:$true] %s304_s24 }
  0x31   : > { %v205_v8 = vld [vmem:[%s176_s11] sm:$0xf]  ;;  %s573_s19 = sshra.s32 %s305_s24, 4  ;;  %s579_s8 = scalar_lea.hbm %s796_s3, 8  ;;  %s574_s19 = int_to_ptr.hbm [resolvable:$true] %s573_s19 }
  0x32   : > { %v498_v9 = vld [vmem:[%s795_s2] ss:$0 sm:$0xff]  ;;  %s575_s27 = scalar_lea.hbm %s574_s19, 4  ;;  %p580_p12 = scmp.lt.s32.totalorder %s574_s19, %s796_s3 }
  0x33   : > { %275 = vmatpush.bf16.msra.mxu0 %v437_v1  ;;  %p576_p1 = scmp.ne.s32.totalorder %s574_s19, %s575_s27  ;;  %p581_p8 = scmp.lt.s32.totalorder %s579_s8, %s575_s27 }
  0x35   : > { %p577_p3 = pnand %p576_p1, %p714_p13  ;;  %p582_p7 = por %p581_p8, %p580_p12 }
  0x37   : > { %276 = vmatpush.bf16.msra.mxu0 %v436_v2  ;;  %p578_p5 = pneg %p577_p3 }
  0x39   : > { %p583_p9 = pnand %p582_p7, %p578_p5 }
  0x3b   : > { %277 = vmatpush.bf16.msra.mxu0 %v435_v3 }
  0x3f   : > { %278 = vmatpush.bf16.msra.mxu0 %v434_v4 }
  0x43   : > { %279 = vmatpush.bf16.msra.mxu0 %v433_v5 }
  0x47   : > { %280 = vmatpush.bf16.msra.mxu0 %v432_v6 }
  0x4b   : > { %281 = vmatpush.bf16.msra.mxu0 %v431_v7 }
  0x4e   : > { %282 = vmatmul.bf16.vlgmr.msra.gmra.mxu0 %v205_v8 }
  0xcb   : > { %v283_v10 = vpop.f32.mrf.mxu0 }
  0xcc   : > { %v284_v11 = vadd.f32 %v498_v9, %v283_v10 }
  0xce   : > { %v287_v12 = vpack.c.bf16 %v284_v11, %v284_v11 }
  0xd0   : > { %288 = vst [vmem:[%s204_s22] sm:$0xf] %v287_v12 }
  0xd1   : > { %586 = shalt.err (!%p583_p9)
}
  0xd2   : > { %445 = dma.vmem_to_hbm [thread:$0]  (%p714_p13), %s303_s23, 64, %s305_s24, %s290_s25  }
  0xd3   : > { %v285_v13 = vpop.f32.mrf.mxu0 }
  0xd4 PF: > { %s316_s5 = sand.u32 1, %s617_s12   ;;  %p802_p10 = scmp.ge.s32.totalorder %s629_s15, 2 }
  0xd5   : > { %s317_s11 = scalar_lea.sflag [#allocation4], %s316_s5 }
  0xd6   : > { %p456_p11 = pnand %p802_p10, %p719_p4 }
  0xd8   : > { %p457_p0 = pneg %p456_p11 }
  0xda   : > { %612 = dma.done.wait (%p457_p0), %s317_s11, 64  }
  0xdb   : > { %614 = vsyncadd (%p457_p0), %s317_s11, 4294967232  ;;  %p17_p2 = scmp.ge.s32.totalorder %s694_s26, 4   ;;  %s803_s12 = smov %s621_s13 }
  0xdc   : > { %s804_s13 = smov %s625_s14  ;;  %s805_s14 = smov %s706_s29 }
  0xdd   : > { %s806_s15 = smov %s694_s26  ;;  %19 = sbr.rel (!%p17_p2) target bundleno = 6 (0x6), region = 81 }
  0xe2   :  { %323 = vsyncpa [#allocation3], 1 }
  0xe3   :  { %325 = vsyncpa [#allocation3 + $0x1], 1 }
  0xe4   :  { %326 = vsyncpa [#allocation6], 1 }
  0xe5   :  { %327 = vsyncpa [#allocation4], 1 }
  0xe6   :  { %329 = vsyncpa [#allocation4 + $0x1], 1 }

// kernel: tpu_custom_call.1
= control target key start
LH: loop header
LB: loop body
LE: loop exit
PB: predicated region body
PF: predicated region fallthrough
CT: control target
= control target key end

     0   :  { %8 = vsyncpa [#allocation3], 0  ;;  %s793_s0 = inlined_call_operand.hbm [shape: bf16[16,128], index: 0, kind: input, shape index: {}]   ;;  %s794_s1 = inlined_call_operand.hbm [shape: bf16[128,128], index: 1, kind: input, shape index: {}]   ;;  %s795_s2 = inlined_call_operand.vmem [shape: f32[1,128], index: 2, kind: input, shape index: {}]   ;;  %s796_s3 = inlined_call_operand.hbm [shape: bf16[16,128], index: 3, kind: output, shape index: {}]  }
   0x1   :  { %10 = vsyncpa [#allocation3 + $0x1], 0 }
   0x2   :  { %11 = vsyncpa [#allocation6], 0 }
   0x3   :  { %12 = vsyncpa [#allocation4], 0 }
   0x4   :  { %14 = vsyncpa [#allocation4 + $0x1], 0  ;;  %s654_s12 = smov 0   ;;  %s656_s13 = smov 0  }
   0x5   :  { %s658_s14 = smov 0   ;;  %s660_s15 = smov 0  }
   0x6 LB: > { %s130_s18 = sshll.u32 %s794_s1, 4  ;;  %s678_s19 = sadd.s32 4294967295, %s629_s15   ;;  %s629_s15 = sphi %s660_s15, %s806_s15   ;;  %s625_s14 = sphi %s658_s14, %s805_s14   ;;  %s621_s13 = sphi %s656_s13, %s804_s13   ;;  %s617_s12 = sphi %s654_s12, %s803_s12   ;;  %s131_s18 = int_to_ptr.hbm [resolvable:$true] %s130_s18 }
   0x7   : > { %p386_p0 = scmp.ge.s32.totalorder %s629_s15, 1  ;;  %p41_p1 = scmp.eq.s32.totalorder %s678_s19, 0 }
   0x8   : > { %p119_p2 = scmp.lt.s32.totalorder %s629_s15, 3  ;;  %s631_s21 = smov [#allocation5]  }
   0x9   : > { %s132_s22 = sshll.u32 %s631_s21, 4  ;;  %s632_s23 = smov 64   ;;  %s133_s22 = int_to_ptr.vmem [resolvable:$true] %s132_s22 }
   0xa   : > { %p683_p3 = pnand %p386_p0, %p119_p2  ;;  %s633_s24 = smov 4  }
   0xb   : > { %s385_s25 = sadd.s32 4294967294, %s629_s15   ;;  %s694_s26 = sadd.s32 1, %s629_s15  }
   0xc   : > { %p447_p4 = pneg %p683_p3  ;;  %s27_s27 = sadd.s32 1, %s625_s14 }
   0xd   : > { %s24_s28 = ssub.s32 %s629_s15, %s694_s26  ;;  %p34_p7 = scmp.ne.s32.totalorder %s625_s14, %s621_s13 }
   0xe   : > { %p448_p6 = pnand %p447_p4, %p41_p1  ;;  %p25_p8 = scmp.eq.s32.totalorder %s24_s28, 0 }
   0xf   : > { %p35_p9 = scmp.eq.s32.totalorder %s629_s15, 0  ;;  %p40_p10 = scmp.ne.s32.totalorder %s621_s13, %s617_s12 }
  0x10   : > { %450 = dma.hbm_to_vmem [thread:$0]  (!%p448_p6), %s131_s18, 1024, %s133_s22, [#allocation6], %s632_s23, %s632_s23, %s633_s24  }
  0x11   : > { %p106_p11 = scmp.eq.s32.totalorder %s678_s19, 1  ;;  %p710_p12 = por %p41_p1, %p40_p10 }
  0x12   : > { %s706_s29 = scalar_select %p25_p8, %s625_s14, %s27_s27  }
  0x13   : > { %p714_p13 = por %p106_p11, %p34_p7  ;;  %p112_p0 = scmp.eq.s32.totalorder %s385_s25, 1 }
  0x14   : > { %p36_p2 = por %p35_p9, %p34_p7  ;;  %s149_s5 = sand.u32 1, %s625_s14  }
  0x15   : > { %p719_p4 = por %p112_p0, %p40_p10  ;;  %p460_p6 = scmp.lt.s32.totalorder %s629_s15, 2 }
  0x16   : > { %s389_s7 = sshll.u32 %s149_s5, 2  ;;  %s390_s8 = sshll.u32 %s629_s15, 2 }
  0x17   : > { %s157_s11 = scalar_lea.hbm %s793_s0, %s390_s8  ;;  %s153_s17 = scalar_lea.vmem [#allocation2], %s389_s7 }
  0x18   : > { %s159_s16 = sshll.u32 %s157_s11, 4  ;;  %s161_s18 = sshll.u32 %s153_s17, 4  ;;  %s160_s16 = int_to_ptr.hbm [resolvable:$true] %s159_s16  ;;  %s162_s18 = int_to_ptr.vmem [resolvable:$true] %s161_s18 }
  0x19   : > { %p728_p8 = pnand %p460_p6, %p36_p2  ;;  %s150_s22 = scalar_lea.sflag [#allocation3], %s149_s5 }
  0x1a   : > { %s529_s23 = sshra.s32 %s160_s16, 4  ;;  %s536_s28 = scalar_lea.hbm %s793_s0, 8  ;;  %s530_s23 = int_to_ptr.hbm [resolvable:$true] %s529_s23 }
  0x1b   : > { %s531_s24 = scalar_lea.hbm %s530_s23, 4  ;;  %p533_p9 = pneg %p728_p8 }
  0x1c   : > { %p532_p7 = scmp.ne.s32.totalorder %s530_s23, %s531_s24  ;;  %p537_p0 = scmp.lt.s32.totalorder %s530_s23, %s793_s0 }
  0x1d   : > { %p538_p2 = scmp.lt.s32.totalorder %s536_s28, %s531_s24 }
  0x1e   : > { %p534_p10 = pnand %p533_p9, %p532_p7 }
  0x1f   : > { %p539_p6 = por %p538_p2, %p537_p0 }
  0x20   : > { %p535_p11 = pneg %p534_p10 }
  0x22   : > { %p540_p5 = pnand %p539_p6, %p535_p11 }
  0x24   : > { %543 = shalt.err (!%p540_p5)
}
  0x25   : > { %454 = dma.hbm_to_vmem [thread:$0]  (!%p728_p8), %s160_s16, 64, %s162_s18, %s150_s22  }
  0x26   : > { %170 = sbr.rel (%p683_p3) target bundleno = 212 (0xd4), region = 32  ;;  %s745_s5 = sand.u32 (!%p683_p3), 1, %s621_s13  }
  0x27   : > { %s392_s9 = sshll.u32 (!%p683_p3), %s745_s5, 2  ;;  %s173_s10 = scalar_lea.sflag (!%p683_p3), [#allocation3], %s745_s5 }
  0x28   : > { %s176_s11 = scalar_lea.vmem (!%p683_p3), [#allocation2], %s392_s9 }
  0x2b   : > { %604 = dma.done.wait (%p710_p12), %s173_s10, 64  }
  0x2c   : > { %606 = vsyncadd (%p710_p12), %s173_s10, 4294967232 }
  0x2d   : > { %608 = dma.done.wait (%p41_p1), [#allocation6], 1024  }
  0x2e   : > { %610 = vsyncadd (%p41_p1), [#allocation6], 4294966272  ;;  %v438_v0 = vld [vmem:[#allocation5 + $0x38] sm:$0xff]  ;;  %v437_v1 = vld [vmem:[#allocation5 + $0x30] sm:$0xff]  ;;  %s428_s20 = sshll.u32 %s678_s19, 2  ;;  %s204_s22 = scalar_lea.vmem [#allocation7], %s392_s9 }
  0x2f   : > { %274 = vmatpush.bf16.msra.mxu0 %v438_v0  ;;  %v436_v2 = vld [vmem:[#allocation5 + $0x28] sm:$0xff]  ;;  %v435_v3 = vld [vmem:[#allocation5 + $0x20] sm:$0xff]  ;;  %v434_v4 = vld [vmem:[#allocation5 + $0x18] sm:$0xff]  ;;  %s300_s21 = scalar_lea.hbm %s796_s3, %s428_s20  ;;  %s302_s23 = sshll.u32 %s204_s22, 4  ;;  %s303_s23 = int_to_ptr.vmem [resolvable:$true] %s302_s23 }
  0x30   : > { %v433_v5 = vld [vmem:[#allocation5 + $0x10] sm:$0xff]  ;;  %v432_v6 = vld [vmem:[#allocation5 + $0x8] sm:$0xff]  ;;  %v431_v7 = vld [vmem:[#allocation5] sm:$0xff]  ;;  %s304_s24 = sshll.u32 %s300_s21, 4  ;;  %s290_s25 = scalar_lea.sflag [#allocation4], %s745_s5  ;;  %s305_s24 = int_to_ptr.hbm [resolvable:$true] %s304_s24 }
  0x31   : > { %v205_v8 = vld [vmem:[%s176_s11] sm:$0xf]  ;;  %s573_s19 = sshra.s32 %s305_s24, 4  ;;  %s579_s8 = scalar_lea.hbm %s796_s3, 8  ;;  %s574_s19 = int_to_ptr.hbm [resolvable:$true] %s573_s19 }
  0x32   : > { %v498_v9 = vld [vmem:[%s795_s2] ss:$0 sm:$0xff]  ;;  %s575_s27 = scalar_lea.hbm %s574_s19, 4  ;;  %p580_p12 = scmp.lt.s32.totalorder %s574_s19, %s796_s3 }
  0x33   : > { %275 = vmatpush.bf16.msra.mxu0 %v437_v1  ;;  %p576_p1 = scmp.ne.s32.totalorder %s574_s19, %s575_s27  ;;  %p581_p8 = scmp.lt.s32.totalorder %s579_s8, %s575_s27 }
  0x35   : > { %p577_p3 = pnand %p576_p1, %p714_p13  ;;  %p582_p7 = por %p581_p8, %p580_p12 }
  0x37   : > { %276 = vmatpush.bf16.msra.mxu0 %v436_v2  ;;  %p578_p5 = pneg %p577_p3 }
  0x39   : > { %p583_p9 = pnand %p582_p7, %p578_p5 }
  0x3b   : > { %277 = vmatpush.bf16.msra.mxu0 %v435_v3 }
  0x3f   : > { %278 = vmatpush.bf16.msra.mxu0 %v434_v4 }
  0x43   : > { %279 = vmatpush.bf16.msra.mxu0 %v433_v5 }
  0x47   : > { %280 = vmatpush.bf16.msra.mxu0 %v432_v6 }
  0x4b   : > { %281 = vmatpush.bf16.msra.mxu0 %v431_v7 }
  0x4e   : > { %282 = vmatmul.bf16.vlgmr.msra.gmra.mxu0 %v205_v8 }
  0xcb   : > { %v283_v10 = vpop.f32.mrf.mxu0 }
  0xcc   : > { %v284_v11 = vadd.f32 %v498_v9, %v283_v10 }
  0xce   : > { %v287_v12 = vpack.c.bf16 %v284_v11, %v284_v11 }
  0xd0   : > { %288 = vst [vmem:[%s204_s22] sm:$0xf] %v287_v12 }
  0xd1   : > { %586 = shalt.err (!%p583_p9)
}
  0xd2   : > { %445 = dma.vmem_to_hbm [thread:$0]  (%p714_p13), %s303_s23, 64, %s305_s24, %s290_s25  }
  0xd3   : > { %v285_v13 = vpop.f32.mrf.mxu0 }
  0xd4 PF: > { %s316_s5 = sand.u32 1, %s617_s12   ;;  %p802_p10 = scmp.ge.s32.totalorder %s629_s15, 2 }
  0xd5   : > { %s317_s11 = scalar_lea.sflag [#allocation4], %s316_s5 }
  0xd6   : > { %p456_p11 = pnand %p802_p10, %p719_p4 }
  0xd8   : > { %p457_p0 = pneg %p456_p11 }
  0xda   : > { %612 = dma.done.wait (%p457_p0), %s317_s11, 64  }
  0xdb   : > { %614 = vsyncadd (%p457_p0), %s317_s11, 4294967232  ;;  %p17_p2 = scmp.ge.s32.totalorder %s694_s26, 4   ;;  %s803_s12 = smov %s621_s13 }
  0xdc   : > { %s804_s13 = smov %s625_s14  ;;  %s805_s14 = smov %s706_s29 }
  0xdd   : > { %s806_s15 = smov %s694_s26  ;;  %19 = sbr.rel (!%p17_p2) target bundleno = 6 (0x6), region = 81 }
  0xe2   :  { %323 = vsyncpa [#allocation3], 1 }
  0xe3   :  { %325 = vsyncpa [#allocation3 + $0x1], 1 }
  0xe4   :  { %326 = vsyncpa [#allocation6], 1 }
  0xe5   :  { %327 = vsyncpa [#allocation4], 1 }
  0xe6   :  { %329 = vsyncpa [#allocation4 + $0x1], 1 }

</bundles_post_ra>
